<compile_context>
chip_gen: v7x
topology: tpu7x:2x2x1
jax: 0.10.0
libtpu: 0.0.40
codegen_flags: <defaults>
</compile_context>

<pallas_src>
import functools
from typing import NamedTuple

import jax
import jax.numpy as jnp
from jax.experimental import pallas as pl
from jax.experimental.pallas import tpu as pltpu


def _round_up(x, m):
    return (x + m - 1) // m * m


def _cdiv(a, b):
    return (a + b - 1) // b


class _TileCfg(NamedTuple):
    num_tiles: int       # T
    imgs_per_step: int   # images (groups of T rows) handled per grid step
    grid: int            # number of grid steps
    emb: int             # E
    h1: int
    h2: int


def _choose_tiling(batch, num_tiles, m_tile):
    """Pick images-per-step and grid length.

    * one full-block step for small batches (blocks equal full dims -> no
      (8,128) divisibility constraints),
    * >=2 steps whenever that costs zero padding (keeps both v7x TensorCores
      busy; harmless extra step overhead on single-TC v5e/v6e),
    * for large batches, ~m_tile-row blocks with the per-step image count
      rounded to a multiple of 8 so every BlockSpec stays (8,128)-legal.
    """
    ips_cap = max(1, m_tile // num_tiles)
    if batch > ips_cap:
        n_steps = _cdiv(batch, ips_cap)
        ips = _round_up(_cdiv(batch, n_steps), 8)
    elif batch >= 16 and (batch // 2) % 8 == 0:
        ips = batch // 2
    elif batch >= 16 and batch % 8 == 0:
        ips = 8
    else:
        ips = batch
    return ips, _cdiv(batch, ips)


def _mlp_image_kernel(x_ref, w1_ref, b1_ref, w2_ref, b2_ref, w3_ref,
                      pool_ref, const_ref, out_ref):
    # x_ref: (M_TILE, E) f32; rows are flattened (image, tile) pairs.
    # Cast to bf16 in-kernel (VPU work hidden under the MXU) so the wrapper
    # never materializes a padded/bf16 copy of the activations.
    x = x_ref[...].astype(jnp.bfloat16)

    # fc1 + ReLU : (M_TILE, E) @ (E, H1), bf16 MXU with f32 accumulation.
    h1 = jnp.dot(x, w1_ref[...], preferred_element_type=jnp.float32)
    h1 = jnp.maximum(h1 + b1_ref[...], 0.0)

    # fc2 + ReLU : (M_TILE, H1) @ (H1, H2)
    h2 = jnp.dot(h1.astype(jnp.bfloat16), w2_ref[...],
                 preferred_element_type=jnp.float32)
    h2 = jnp.maximum(h2 + b2_ref[...], 0.0)

    # fc3 (out_features=1) as a VPU multiply + XLU lane reduce -> per-row score.
    s = jnp.sum(h2 * w3_ref[...], axis=-1, keepdims=True)        # (M_TILE, 1)

    # Fused tiles->image linear: pool[i, r] = wimg[r % T] * (r // T == i), so
    # pool @ s is each image's wimg-weighted sum over its T tile scores.  The
    # remaining constant b3*sum(wimg) + bimg comes in as an SMEM scalar.
    img = jnp.dot(pool_ref[...], s, preferred_element_type=jnp.float32)
    out_ref[...] = img + const_ref[0, 0]


def prepare_params(params, *, batch_size, m_tile=1024):
    """One-time parameter prep, hoisted out of the per-forward hot path.

    Casts the big matmul weights to bf16 (f32 accumulation happens in-kernel),
    builds the block-local tile->image pooling matrix and folds the scalar
    constant.  Returns (static tiling config, dict of device arrays).
    """
    w1, b1, w2, b2, w3, b3, wimg, bimg = params
    E, H1 = w1.shape
    H2 = w2.shape[1]
    T = wimg.shape[-1]

    ips, grid = _choose_tiling(batch_size, T, m_tile)
    m_tile_rows = ips * T

    # pool[i, r] = wimg[r % T] if r // T == i else 0   -- (ips, M_TILE), f32.
    row = jnp.arange(m_tile_rows)
    wrow = jnp.tile(wimg.reshape(T).astype(jnp.float32), ips)
    pool = jnp.where(row[None, :] // T == jnp.arange(ips)[:, None],
                     wrow[None, :], 0.0)
    const = (b3[0, 0] * jnp.sum(wimg) + bimg[0, 0]).reshape(1, 1).astype(jnp.float32)

    weights = dict(
        w1=w1.astype(jnp.bfloat16),
        b1=b1.astype(jnp.float32),
        w2=w2.astype(jnp.bfloat16),
        b2=b2.astype(jnp.float32),
        w3=w3.reshape(1, H2).astype(jnp.float32),
        pool=pool,
        const=const,
    )
    cfg = _TileCfg(num_tiles=T, imgs_per_step=ips, grid=grid,
                   emb=E, h1=H1, h2=H2)
    return cfg, weights


@functools.partial(jax.jit, static_argnames=("cfg",))
def tile_to_image_forward(tile_embeddings, weights, cfg):
    """tile_embeddings: (B, T, 1, E) float32.  Returns (image_outputs (B,1), None).

    The unused `tile_outputs` argument of the PyTorch forward is dropped.
    """
    B, T, S, E = tile_embeddings.shape
    assert S == 1, "TileToImage_LinearEmbeddings requires series_length == 1"
    assert T == cfg.num_tiles and E == cfg.emb

    ips, G = cfg.imgs_per_step, cfg.grid
    m_tile_rows = ips * T
    b_pad = ips * G

    x = tile_embeddings.reshape(B * T, E)              # free reshape, stays f32
    if b_pad != B:
        # Pad in whole images (zeros); padded images land in output slots >= B
        # and are sliced away below, so their garbage scores are harmless.
        x = jnp.pad(x, ((0, (b_pad - B) * T), (0, 0)))

    out = pl.pallas_call(
        _mlp_image_kernel,
        out_shape=jax.ShapeDtypeStruct((b_pad, 1), jnp.float32),
        grid_spec=pl.GridSpec(
            grid=(G,),
            in_specs=[
                pl.BlockSpec((m_tile_rows, E), lambda i: (i, 0)),      # x rows (f32)
                pl.BlockSpec((E, cfg.h1), lambda i: (0, 0)),           # w1 (resident)
                pl.BlockSpec((1, cfg.h1), lambda i: (0, 0)),           # b1
                pl.BlockSpec((cfg.h1, cfg.h2), lambda i: (0, 0)),      # w2
                pl.BlockSpec((1, cfg.h2), lambda i: (0, 0)),           # b2
                pl.BlockSpec((1, cfg.h2), lambda i: (0, 0)),           # w3 as a row
                pl.BlockSpec((ips, m_tile_rows), lambda i: (0, 0)),    # pooling matrix
                pl.BlockSpec(memory_space=pltpu.MemorySpace.SMEM),     # folded constant
            ],
            out_specs=pl.BlockSpec((ips, 1), lambda i: (i, 0)),
        ),
        compiler_params=pltpu.CompilerParams(
            dimension_semantics=("parallel",)),
    )(x, weights["w1"], weights["b1"], weights["w2"], weights["b2"],
      weights["w3"], weights["pool"], weights["const"])

    image_outputs = out if b_pad == B else out[:B]
    return image_outputs, None


def init_params(key, num_tiles=8, tile_embedding_size=516):
    """Deterministic synthetic init (stand-in for RetinaNet / Xavier inits)."""
    E = tile_embedding_size
    H1 = min(512, E)
    H2 = 64
    ks = jax.random.split(key, 8)
    scale = lambda fan_in: 1.0 / jnp.sqrt(jnp.float32(fan_in))
    w1 = jax.random.normal(ks[0], (E, H1), jnp.float32) * scale(E)
    b1 = jax.random.normal(ks[1], (1, H1), jnp.float32) * 0.01
    w2 = jax.random.normal(ks[2], (H1, H2), jnp.float32) * scale(H1)
    b2 = jax.random.normal(ks[3], (1, H2), jnp.float32) * 0.01
    w3 = jax.random.normal(ks[4], (H2, 1), jnp.float32) * scale(H2)
    b3 = jax.random.normal(ks[5], (1, 1), jnp.float32) * 0.01
    wimg = jax.random.normal(ks[6], (1, num_tiles), jnp.float32) * scale(num_tiles)
    bimg = jax.random.normal(ks[7], (1, 1), jnp.float32) * 0.01
    return (w1, b1, w2, b2, w3, b3, wimg, bimg)


def reference_forward(tile_embeddings, params):
    """Pure-JAX f32 reference reproducing the PyTorch forward semantics."""
    w1, b1, w2, b2, w3, b3, wimg, bimg = params
    B, T, S, E = tile_embeddings.shape
    x = tile_embeddings.reshape(B, T, S, E)
    h1 = jax.nn.relu(x @ w1 + b1[0])
    h2 = jax.nn.relu(h1 @ w2 + b2[0])
    t = (h2 @ w3 + b3[0]).reshape(B, T)          # (B, T)
    img = t @ wimg[0][:, None] + bimg[0]         # (B, 1)
    return img


def reference_forward_bf16(tile_embeddings, params):
    """Reference matching the kernel's bf16-input / f32-accumulate numerics."""
    w1, b1, w2, b2, w3, b3, wimg, bimg = params
    B, T, S, E = tile_embeddings.shape
    x = tile_embeddings.reshape(B * T, E).astype(jnp.bfloat16)
    h1 = jax.nn.relu(jnp.dot(x, w1.astype(jnp.bfloat16),
                             preferred_element_type=jnp.float32) + b1)
    h2 = jax.nn.relu(jnp.dot(h1.astype(jnp.bfloat16), w2.astype(jnp.bfloat16),
                             preferred_element_type=jnp.float32) + b2)
    t = (jnp.sum(h2 * w3.reshape(1, -1), axis=-1).reshape(B, T) + b3[0, 0])
    return t @ wimg.reshape(T, 1) + bimg[0, 0]


if __name__ == "__main__":
    B, T, S, E = 2, 8, 1, 516   # batch=2, num_tiles=8, series_length=1, emb=516
    key = jax.random.PRNGKey(0)
    k_x, k_p = jax.random.split(key)
    tile_embeddings = jax.random.normal(k_x, (B, T, S, E), jnp.float32)
    params = init_params(k_p, num_tiles=T, tile_embedding_size=E)

    # One-time parameter prep (hoisted out of the per-forward hot path).
    cfg, weights = prepare_params(params, batch_size=B)

    image_outputs, second = tile_to_image_forward(tile_embeddings, weights, cfg=cfg)
    image_outputs = jax.block_until_ready(image_outputs)
    assert second is None
    assert image_outputs.shape == (B, 1)

    # Tight check against a reference with matching bf16 numerics, loose check
    # against the pure-f32 PyTorch-equivalent reference.
    ref_bf16 = reference_forward_bf16(tile_embeddings, params)
    ref_f32 = reference_forward(tile_embeddings, params)
    assert jnp.allclose(image_outputs, ref_bf16, atol=5e-3, rtol=5e-3), (
        f"bf16-matched mismatch: {image_outputs} vs {ref_bf16}")
    assert jnp.allclose(image_outputs, ref_f32, atol=5e-2, rtol=5e-2), (
        f"f32 reference mismatch: {image_outputs} vs {ref_f32}")

    print("KERNEL_OK")
</pallas_src>

<mosaic_0001>
module attributes {stable_mosaic.version = 11 : i64} {
  func.func @_mlp_image_kernel(%arg0: i32, %arg1: memref<16x516xf32, #tpu.memory_space<vmem>>, %arg2: memref<516x512xbf16, #tpu.memory_space<vmem>>, %arg3: memref<1x512xf32, #tpu.memory_space<vmem>>, %arg4: memref<512x64xbf16, #tpu.memory_space<vmem>>, %arg5: memref<1x64xf32, #tpu.memory_space<vmem>>, %arg6: memref<1x64xf32, #tpu.memory_space<vmem>>, %arg7: memref<2x16xf32, #tpu.memory_space<vmem>>, %arg8: memref<1x1xf32, #tpu.memory_space<smem>>, %arg9: memref<2x1xf32, #tpu.memory_space<vmem>>) attributes {dimension_semantics = [#tpu.dimension_semantics<parallel>], iteration_bounds = array<i64: 1>, scalar_prefetch = 0 : i64, scratch_operands = 0 : i64, tpu.core_type = #tpu.core_type<tc>, window_params = [{transform_indices = @transform_0, window_bounds = array<i64: 16, 516>}, {pipeline_mode = #tpu.pipeline_mode<synchronous>, transform_indices = @transform_1, window_bounds = array<i64: 516, 512>}, {pipeline_mode = #tpu.pipeline_mode<synchronous>, transform_indices = @transform_2, window_bounds = array<i64: 1, 512>}, {pipeline_mode = #tpu.pipeline_mode<synchronous>, transform_indices = @transform_3, window_bounds = array<i64: 512, 64>}, {pipeline_mode = #tpu.pipeline_mode<synchronous>, transform_indices = @transform_4, window_bounds = array<i64: 1, 64>}, {pipeline_mode = #tpu.pipeline_mode<synchronous>, transform_indices = @transform_5, window_bounds = array<i64: 1, 64>}, {pipeline_mode = #tpu.pipeline_mode<synchronous>, transform_indices = @transform_6, window_bounds = array<i64: 2, 16>}, {transform_indices = @transform_7, window_bounds = array<i64: 1, 1>}, {transform_indices = @transform_8, window_bounds = array<i64: 2, 1>}]} {
    %c0 = arith.constant 0 : index
    %c0_0 = arith.constant 0 : index
    %0 = vector.load %arg1[%c0, %c0_0] : memref<16x516xf32, #tpu.memory_space<vmem>>, vector<16x516xf32>
    %1 = arith.truncf %0 : vector<16x516xf32> to vector<16x516xbf16>
    %c0_1 = arith.constant 0 : index
    %c0_2 = arith.constant 0 : index
    %2 = vector.load %arg2[%c0_1, %c0_2] : memref<516x512xbf16, #tpu.memory_space<vmem>>, vector<516x512xbf16>
    %cst = arith.constant dense<0.000000e+00> : vector<16x512xf32>
    %3 = tpu.matmul %1, %2, %cst {dimension_numbers = #tpu.dot_dimension_numbers<[1], [0], [0], [1], [0, 0, 1, 1], [], []>} : vector<16x516xbf16>, vector<516x512xbf16>, vector<16x512xf32> -> vector<16x512xf32>
    %c0_3 = arith.constant 0 : index
    %c0_4 = arith.constant 0 : index
    %4 = vector.load %arg3[%c0_3, %c0_4] : memref<1x512xf32, #tpu.memory_space<vmem>>, vector<1x512xf32>
    %5 = vector.broadcast %4 : vector<1x512xf32> to vector<16x512xf32>
    %6 = arith.addf %3, %5 : vector<16x512xf32>
    %cst_5 = arith.constant 0.000000e+00 : f32
    %7 = vector.broadcast %cst_5 : f32 to vector<16x512xf32>
    %8 = arith.maximumf %6, %7 : vector<16x512xf32>
    %9 = arith.truncf %8 : vector<16x512xf32> to vector<16x512xbf16>
    %c0_6 = arith.constant 0 : index
    %c0_7 = arith.constant 0 : index
    %10 = vector.load %arg4[%c0_6, %c0_7] : memref<512x64xbf16, #tpu.memory_space<vmem>>, vector<512x64xbf16>
    %cst_8 = arith.constant dense<0.000000e+00> : vector<16x64xf32>
    %11 = tpu.matmul %9, %10, %cst_8 {dimension_numbers = #tpu.dot_dimension_numbers<[1], [0], [0], [1], [0, 0, 1, 1], [], []>} : vector<16x512xbf16>, vector<512x64xbf16>, vector<16x64xf32> -> vector<16x64xf32>
    %c0_9 = arith.constant 0 : index
    %c0_10 = arith.constant 0 : index
    %12 = vector.load %arg5[%c0_9, %c0_10] : memref<1x64xf32, #tpu.memory_space<vmem>>, vector<1x64xf32>
    %13 = vector.broadcast %12 : vector<1x64xf32> to vector<16x64xf32>
    %14 = arith.addf %11, %13 : vector<16x64xf32>
    %cst_11 = arith.constant 0.000000e+00 : f32
    %15 = vector.broadcast %cst_11 : f32 to vector<16x64xf32>
    %16 = arith.maximumf %14, %15 : vector<16x64xf32>
    %c0_12 = arith.constant 0 : index
    %c0_13 = arith.constant 0 : index
    %17 = vector.load %arg6[%c0_12, %c0_13] : memref<1x64xf32, #tpu.memory_space<vmem>>, vector<1x64xf32>
    %18 = vector.broadcast %17 : vector<1x64xf32> to vector<16x64xf32>
    %19 = arith.mulf %16, %18 : vector<16x64xf32>
    %cst_14 = arith.constant dense<0.000000e+00> : vector<16xf32>
    %20 = vector.multi_reduction <add>, %19, %cst_14 [1] : vector<16x64xf32> to vector<16xf32>
    %21 = vector.shape_cast %20 : vector<16xf32> to vector<16x1xf32>
    %c0_15 = arith.constant 0 : index
    %c0_16 = arith.constant 0 : index
    %22 = vector.load %arg7[%c0_15, %c0_16] : memref<2x16xf32, #tpu.memory_space<vmem>>, vector<2x16xf32>
    %cst_17 = arith.constant dense<0.000000e+00> : vector<2x1xf32>
    %23 = tpu.matmul %22, %21, %cst_17 {dimension_numbers = #tpu.dot_dimension_numbers<[1], [0], [0], [1], [0, 0, 1, 1], [], []>} : vector<2x16xf32>, vector<16x1xf32>, vector<2x1xf32> -> vector<2x1xf32>
    %c0_18 = arith.constant 0 : index
    %c0_19 = arith.constant 0 : index
    %24 = memref.load %arg8[%c0_18, %c0_19] : memref<1x1xf32, #tpu.memory_space<smem>>
    %25 = vector.broadcast %24 : f32 to vector<2x1xf32>
    %26 = arith.addf %23, %25 : vector<2x1xf32>
    %c0_20 = arith.constant 0 : index
    %c0_21 = arith.constant 0 : index
    %27 = vector.load %arg9[%c0_20, %c0_21] : memref<2x1xf32, #tpu.memory_space<vmem>>, vector<2x1xf32>
    tpu.vector_store %arg9[%c0_20, %c0_21], %26 {strides = array<i32>} : memref<2x1xf32, #tpu.memory_space<vmem>>, vector<2x1xf32>,
    return
  }
  func.func @transform_0(%arg0: i32) -> (i32, i32) {
    %c0_i32 = arith.constant 0 : i32
    %c0_i32_0 = arith.constant 0 : i32
    return %arg0, %c0_i32 : i32, i32
  }
  func.func @transform_1(%arg0: i32) -> (i32, i32) {
    %c0_i32 = arith.constant 0 : i32
    %c0_i32_0 = arith.constant 0 : i32
    %c0_i32_1 = arith.constant 0 : i32
    return %c0_i32, %c0_i32_0 : i32, i32
  }
  func.func @transform_2(%arg0: i32) -> (i32, i32) {
    %c0_i32 = arith.constant 0 : i32
    %c0_i32_0 = arith.constant 0 : i32
    %c0_i32_1 = arith.constant 0 : i32
    return %c0_i32, %c0_i32_0 : i32, i32
  }
  func.func @transform_3(%arg0: i32) -> (i32, i32) {
    %c0_i32 = arith.constant 0 : i32
    %c0_i32_0 = arith.constant 0 : i32
    %c0_i32_1 = arith.constant 0 : i32
    return %c0_i32, %c0_i32_0 : i32, i32
  }
  func.func @transform_4(%arg0: i32) -> (i32, i32) {
    %c0_i32 = arith.constant 0 : i32
    %c0_i32_0 = arith.constant 0 : i32
    %c0_i32_1 = arith.constant 0 : i32
    return %c0_i32, %c0_i32_0 : i32, i32
  }
  func.func @transform_5(%arg0: i32) -> (i32, i32) {
    %c0_i32 = arith.constant 0 : i32
    %c0_i32_0 = arith.constant 0 : i32
    %c0_i32_1 = arith.constant 0 : i32
    return %c0_i32, %c0_i32_0 : i32, i32
  }
  func.func @transform_6(%arg0: i32) -> (i32, i32) {
    %c0_i32 = arith.constant 0 : i32
    %c0_i32_0 = arith.constant 0 : i32
    %c0_i32_1 = arith.constant 0 : i32
    return %c0_i32, %c0_i32_0 : i32, i32
  }
  func.func @transform_7(%arg0: i32) -> (i32, i32) {
    %c0_i32 = arith.constant 0 : i32
    %c0_i32_0 = arith.constant 0 : i32
    %c0_i32_1 = arith.constant 0 : i32
    return %c0_i32, %c0_i32_0 : i32, i32
  }
  func.func @transform_8(%arg0: i32) -> (i32, i32) {
    %c0_i32 = arith.constant 0 : i32
    %c0_i32_0 = arith.constant 0 : i32
    return %arg0, %c0_i32 : i32, i32
  }
}

</mosaic_0001>

<bundles_post_ra>
// kernel: tile_to_image_forward.1
= control target key start
LH: loop header
LB: loop body
LE: loop exit
PB: predicated region body
PF: predicated region fallthrough
CT: control target
= control target key end

     0   :  { %14 = vsyncpa [#allocation4], 0  ;;  %s2107_s27 = smov [#allocation3]   ;;  %s2315_s0 = inlined_call_operand.vmem [shape: f32[16,516], index: 0, kind: input, shape index: {}]   ;;  %s2316_s1 = inlined_call_operand.hbm [shape: bf16[516,512], index: 1, kind: input, shape index: {}]   ;;  %s2317_s2 = inlined_call_operand.vmem [shape: f32[1,512], index: 2, kind: input, shape index: {}]   ;;  %s2318_s3 = inlined_call_operand.vmem [shape: bf16[512,64], index: 3, kind: input, shape index: {}]   ;;  %s2319_s4 = inlined_call_operand.vmem [shape: f32[1,64], index: 4, kind: input, shape index: {}]   ;;  %s2320_s5 = inlined_call_operand.vmem [shape: f32[1,64], index: 5, kind: input, shape index: {}]   ;;  %s2321_s6 = inlined_call_operand.vmem [shape: f32[2,16], index: 6, kind: input, shape index: {}]   ;;  %s2322_s7 = inlined_call_operand.<no memory space> [shape: f32[1,1], index: 7, kind: input, shape index: {}]   ;;  %s2323_s8 = inlined_call_operand.vmem [shape: f32[2,1], index: 8, kind: output, shape index: {}]  }
   0x1   :  { %s22_s28 = sshll.u32 %s2107_s27, 4  ;;  %s2083_s9 = scalar_lea.hbm %s2316_s1, 16640  ;;  %s23_s28 = int_to_ptr.vmem [resolvable:$true] %s22_s28 }
   0x2   :  { %p2084_p0 = scmp.ne.s32.totalorder %s2316_s1, %s2083_s9  ;;  %p2087_p1 = scmp.lt.u32.totalorder %s2083_s9, %s2316_s1 }
   0x4   :  { %p2089_p2 = pnand %p2087_p1, %p2084_p0 }
   0x6   :  { %2092 = shalt.err (!%p2089_p2)
}
   0x7   :  { %s2093_s14 = scalar_lea.vmem %s23_s28, 16640  ;;  %p2098_p4 = scmp.lt.s32.totalorder %s23_s28, %s23_s28 }
   0x8   :  { %p2094_p3 = scmp.ne.s32.totalorder %s23_s28, %s2093_s14  ;;  %p2099_p5 = scmp.lt.s32.totalorder %s2093_s14, %s2093_s14 }
   0xa   :  { %p2100_p6 = por %p2099_p5, %p2098_p4 }
   0xc   :  { %p2101_p7 = pnand %p2100_p6, %p2094_p3 }
   0xe   :  { %2104 = shalt.err (!%p2101_p7)
}
   0xf   :  { %s2108_s15 = smov 256   ;;  %s2109_s16 = smov 16  }
  0x10   :  { %28 = dma.hbm_to_vmem [thread:$0]  %s2316_s1, 16640, %s23_s28, [#allocation4], %s2108_s15, %s2108_s15, %s2109_s16  }
  0x11   :  { %2105 = dma.done.wait [#allocation4], 16640  }
  0x12   :  { %2106 = vsyncadd [#allocation4], 4294950656  ;;  %v1855_v0 = vld [vmem:[#allocation3 + $0x4] ss:$16 sps:$4 sm:$0xff]   ;;  %v1857_v1 = vld [vmem:[#allocation3 + $0xc] ss:$16 sps:$4 sm:$0xff]  }
  0x13   :  { %879 = vmatprep.subr.bf16.mxu0 %v1855_v0  ;;  %v1859_v2 = vld [vmem:[#allocation3] ss:$16 sps:$4 sm:$0xff]   ;;  %v1860_v3 = vld [vmem:[#allocation3 + $0x8] ss:$16 sps:$4 sm:$0xff]   ;;  %1008 = vmatprep.subr.bf16.mxu1 %v1857_v1  ;;  %v1861_v4 = vld [vmem:[#allocation3 + $0x24] ss:$16 sps:$4 sm:$0xff]  }
  0x14   :  { %880 = vmatpush1.bf16.msra.mxu0 %v1859_v2  ;;  %1009 = vmatpush1.bf16.msra.mxu1 %v1860_v3  ;;  %v1863_v5 = vld [vmem:[#allocation3 + $0x2c] ss:$16 sps:$4 sm:$0xff]   ;;  %v1865_v6 = vld [vmem:[#allocation3 + $0x20] ss:$16 sps:$4 sm:$0xff]   ;;  %v1866_v7 = vld [vmem:[#allocation3 + $0x28] ss:$16 sps:$4 sm:$0xff]  }
  0x15   :  { %881 = vmatprep.subr.bf16.mxu0 %v1861_v4  ;;  %1010 = vmatprep.subr.bf16.mxu1 %v1863_v5  ;;  %v1867_v8 = vld [vmem:[#allocation3 + $0x44] ss:$16 sps:$4 sm:$0xff]   ;;  %v1869_v9 = vld [vmem:[#allocation3 + $0x4c] ss:$16 sps:$4 sm:$0xff]   ;;  %v1871_v10 = vld [vmem:[#allocation3 + $0x40] ss:$16 sps:$4 sm:$0xff]  }
  0x16   :  { %v1872_v11 = vld [vmem:[#allocation3 + $0x48] ss:$16 sps:$4 sm:$0xff]   ;;  %v1873_v12 = vld [vmem:[#allocation3 + $0x64] ss:$16 sps:$4 sm:$0xff]   ;;  %v1875_v13 = vld [vmem:[#allocation3 + $0x6c] ss:$16 sps:$4 sm:$0xff]  }
  0x17   :  { %v1877_v14 = vld [vmem:[#allocation3 + $0x60] ss:$16 sps:$4 sm:$0xff]   ;;  %v1878_v15 = vld [vmem:[#allocation3 + $0x68] ss:$16 sps:$4 sm:$0xff]   ;;  %v1879_v16 = vld [vmem:[#allocation3 + $0x84] ss:$16 sps:$4 sm:$0xff]  }
  0x18   :  { %882 = vmatpush1.bf16.msra.mxu0 %v1865_v6  ;;  %1011 = vmatpush1.bf16.msra.mxu1 %v1866_v7  ;;  %v1881_v17 = vld [vmem:[#allocation3 + $0x8c] ss:$16 sps:$4 sm:$0xff]   ;;  %v1883_v18 = vld [vmem:[#allocation3 + $0x80] ss:$16 sps:$4 sm:$0xff]   ;;  %v1884_v19 = vld [vmem:[#allocation3 + $0x88] ss:$16 sps:$4 sm:$0xff]  }
  0x19   :  { %883 = vmatprep.subr.bf16.mxu0 %v1867_v8  ;;  %1012 = vmatprep.subr.bf16.mxu1 %v1869_v9  ;;  %v1885_v20 = vld [vmem:[#allocation3 + $0xa4] ss:$16 sps:$4 sm:$0xff]   ;;  %v1887_v21 = vld [vmem:[#allocation3 + $0xac] ss:$16 sps:$4 sm:$0xff]   ;;  %v1889_v22 = vld [vmem:[#allocation3 + $0xa0] ss:$16 sps:$4 sm:$0xff]  }
  0x1a   :  { %v1890_v23 = vld [vmem:[#allocation3 + $0xa8] ss:$16 sps:$4 sm:$0xff]   ;;  %v1891_v24 = vld [vmem:[#allocation3 + $0xc4] ss:$16 sps:$4 sm:$0xff]   ;;  %v1893_v25 = vld [vmem:[#allocation3 + $0xcc] ss:$16 sps:$4 sm:$0xff]  }
  0x1b   :  { %v1895_v26 = vld [vmem:[#allocation3 + $0xc0] ss:$16 sps:$4 sm:$0xff]   ;;  %v1896_v27 = vld [vmem:[#allocation3 + $0xc8] ss:$16 sps:$4 sm:$0xff]   ;;  %v1897_v28 = vld [vmem:[#allocation3 + $0xe4] ss:$16 sps:$4 sm:$0xff]  }
  0x1c   :  { %884 = vmatpush1.bf16.msra.mxu0 %v1871_v10  ;;  %1013 = vmatpush1.bf16.msra.mxu1 %v1872_v11  ;;  %v1899_v29 = vld [vmem:[#allocation3 + $0xec] ss:$16 sps:$4 sm:$0xff]   ;;  %v1901_v30 = vld [vmem:[#allocation3 + $0xe0] ss:$16 sps:$4 sm:$0xff]   ;;  %v1902_v31 = vld [vmem:[#allocation3 + $0xe8] ss:$16 sps:$4 sm:$0xff]  }
  0x1d   :  { %885 = vmatprep.subr.bf16.mxu0 %v1873_v12  ;;  %1014 = vmatprep.subr.bf16.mxu1 %v1875_v13  ;;  %v1903_v32 = vld [vmem:[#allocation3 + $0x104] ss:$16 sps:$4 sm:$0xff]   ;;  %v1905_v33 = vld [vmem:[#allocation3 + $0x10c] ss:$16 sps:$4 sm:$0xff]   ;;  %v1907_v34 = vld [vmem:[#allocation3 + $0x100] ss:$16 sps:$4 sm:$0xff]  }
  0x1e   :  { %v1908_v35 = vld [vmem:[#allocation3 + $0x108] ss:$16 sps:$4 sm:$0xff]   ;;  %v1909_v36 = vld [vmem:[#allocation3 + $0x124] ss:$16 sps:$4 sm:$0xff]   ;;  %v1911_v37 = vld [vmem:[#allocation3 + $0x12c] ss:$16 sps:$4 sm:$0xff]  }
  0x1f   :  { %v1913_v38 = vld [vmem:[#allocation3 + $0x120] ss:$16 sps:$4 sm:$0xff]   ;;  %v1914_v39 = vld [vmem:[#allocation3 + $0x128] ss:$16 sps:$4 sm:$0xff]   ;;  %v1915_v40 = vld [vmem:[#allocation3 + $0x144] ss:$16 sps:$4 sm:$0xff]  }
  0x20   :  { %886 = vmatpush1.bf16.msra.mxu0 %v1877_v14  ;;  %1015 = vmatpush1.bf16.msra.mxu1 %v1878_v15  ;;  %v1917_v41 = vld [vmem:[#allocation3 + $0x14c] ss:$16 sps:$4 sm:$0xff]   ;;  %v1919_v42 = vld [vmem:[#allocation3 + $0x140] ss:$16 sps:$4 sm:$0xff]   ;;  %v1920_v43 = vld [vmem:[#allocation3 + $0x148] ss:$16 sps:$4 sm:$0xff]  }
  0x21   :  { %887 = vmatprep.subr.bf16.mxu0 %v1879_v16  ;;  %1016 = vmatprep.subr.bf16.mxu1 %v1881_v17  ;;  %v1921_v44 = vld [vmem:[#allocation3 + $0x164] ss:$16 sps:$4 sm:$0xff]   ;;  %v1923_v45 = vld [vmem:[#allocation3 + $0x16c] ss:$16 sps:$4 sm:$0xff]   ;;  %v1925_v48 = vld [vmem:[#allocation3 + $0x160] ss:$16 sps:$4 sm:$0xff]  }
  0x22   :  { %v46_v46 = vld [vmem:[%s2315_s0 + $0x8] sm:$0xff]  ;;  %v51_v47 = vld [vmem:[%s2315_s0 + $0x30] sm:$0xff]  ;;  %v45_v4 = vld [vmem:[%s2315_s0] sm:$0xff]  ;;  %vm866_vm0 = vcmask 1041408   ;;  %vm862_vm1 = vcmask 31744   ;;  %vm1505_vm2 = vcmask 523264  }
  0x23   :  { %v1926_v49 = vld [vmem:[#allocation3 + $0x168] ss:$16 sps:$4 sm:$0xff]   ;;  %v56_v50 = vpack.c.bf16 %v51_v47, %v46_v46  ;;  %v1927_v51 = vld [vmem:[#allocation3 + $0x184] ss:$16 sps:$4 sm:$0xff]   ;;  %v1929_v52 = vld [vmem:[#allocation3 + $0x18c] ss:$16 sps:$4 sm:$0xff]  }
  0x24   :  { %888 = vmatpush1.bf16.msra.mxu0 %v1883_v18  ;;  %1017 = vmatpush1.bf16.msra.mxu1 %v1884_v19  ;;  %v1931_v53 = vld [vmem:[#allocation3 + $0x180] ss:$16 sps:$4 sm:$0xff]   ;;  %v1932_v54 = vld [vmem:[#allocation3 + $0x188] ss:$16 sps:$4 sm:$0xff]   ;;  %v1933_v55 = vld [vmem:[#allocation3 + $0x1a4] ss:$16 sps:$4 sm:$0xff]  }
  0x25   :  { %889 = vmatprep.subr.bf16.mxu0 %v1885_v20  ;;  %1018 = vmatprep.subr.bf16.mxu1 %v1887_v21  ;;  %v1935_v56 = vld [vmem:[#allocation3 + $0x1ac] ss:$16 sps:$4 sm:$0xff]   ;;  %v1937_v57 = vld [vmem:[#allocation3 + $0x1a0] ss:$16 sps:$4 sm:$0xff]   ;;  %v1938_v58 = vld [vmem:[#allocation3 + $0x1a8] ss:$16 sps:$4 sm:$0xff]  }
  0x26   :  { %911 = vmatprep.mubr.bf16.mxu0 %v56_v50  ;;  %1040 = vmatprep.mubr.bf16.mxu1 %v56_v50  ;;  %v1939_v59 = vld [vmem:[#allocation3 + $0x1c4] ss:$16 sps:$4 sm:$0xff]   ;;  %v1941_v60 = vld [vmem:[#allocation3 + $0x1cc] ss:$16 sps:$4 sm:$0xff]   ;;  %v1943_v61 = vld [vmem:[#allocation3 + $0x1c0] ss:$16 sps:$4 sm:$0xff]  }
  0x27   :  { %v1944_v62 = vld [vmem:[#allocation3 + $0x1c8] ss:$16 sps:$4 sm:$0xff]   ;;  %v1945_v63 = vld [vmem:[#allocation3 + $0x1e4] ss:$16 sps:$4 sm:$0xff]   ;;  %v1947_v0 = vld [vmem:[#allocation3 + $0x1ec] ss:$16 sps:$4 sm:$0xff]  }
  0x28   :  { %890 = vmatpush1.bf16.msra.mxu0 %v1889_v22  ;;  %1019 = vmatpush1.bf16.msra.mxu1 %v1890_v23  ;;  %v1949_v1 = vld [vmem:[#allocation3 + $0x1e0] ss:$16 sps:$4 sm:$0xff]   ;;  %v1950_v2 = vld [vmem:[#allocation3 + $0x1e8] ss:$16 sps:$4 sm:$0xff]   ;;  %v1953_v3 = vld [vmem:[#allocation3 + $0x204] ss:$16 sps:$4 sm:$0xff]  }
  0x29   :  { %891 = vmatprep.subr.bf16.mxu0 %v1891_v24  ;;  %1020 = vmatprep.subr.bf16.mxu1 %v1893_v25  ;;  %v50_v5 = vld [vmem:[%s2315_s0 + $0x28] sm:$0xff]  ;;  %v1951_v7 = vld [vmem:[#allocation3 + $0x200] ss:$16 sps:$4 sm:$0xff]   ;;  %v1959_v10 = vld [vmem:[#allocation3 + $0x224] ss:$16 sps:$4 sm:$0xff]   ;;  %vm2112_vm3 = vmmov 0  }
  0x2a   :  { %v1956_v6 = vld [vmem:[#allocation3 + $0x20c] ss:$16 sps:$4 sm:$0xff]   ;;  %v1954_v8 = vld [vmem:[#allocation3 + $0x208] ss:$16 sps:$4 sm:$0xff]   ;;  %v55_v9 = vpack.c.bf16 %v50_v5, %v45_v4  ;;  %v1957_v12 = vld [vmem:[#allocation3 + $0x220] ss:$16 sps:$4 sm:$0xff]  }
  0x2b   :  { %v1962_v11 = vld [vmem:[#allocation3 + $0x22c] ss:$16 sps:$4 sm:$0xff]   ;;  %v1960_v13 = vld [vmem:[#allocation3 + $0x228] ss:$16 sps:$4 sm:$0xff]   ;;  %v1965_v14 = vld [vmem:[#allocation3 + $0x244] ss:$16 sps:$4 sm:$0xff]  }
  0x2c   :  { %892 = vmatpush1.bf16.msra.mxu0 %v1895_v26  ;;  %1021 = vmatpush1.bf16.msra.mxu1 %v1896_v27  ;;  %v1968_v15 = vld [vmem:[#allocation3 + $0x24c] ss:$16 sps:$4 sm:$0xff]   ;;  %v1963_v16 = vld [vmem:[#allocation3 + $0x240] ss:$16 sps:$4 sm:$0xff]   ;;  %v1966_v17 = vld [vmem:[#allocation3 + $0x248] ss:$16 sps:$4 sm:$0xff]  }
  0x2d   :  { %893 = vmatprep.subr.bf16.mxu0 %v1897_v28  ;;  %1022 = vmatprep.subr.bf16.mxu1 %v1899_v29  ;;  %v1971_v18 = vld [vmem:[#allocation3 + $0x264] ss:$16 sps:$4 sm:$0xff]   ;;  %v1974_v19 = vld [vmem:[#allocation3 + $0x26c] ss:$16 sps:$4 sm:$0xff]   ;;  %v1969_v20 = vld [vmem:[#allocation3 + $0x260] ss:$16 sps:$4 sm:$0xff]  }
  0x2e   :  { %v1972_v21 = vld [vmem:[#allocation3 + $0x268] ss:$16 sps:$4 sm:$0xff]   ;;  %v1977_v22 = vld [vmem:[#allocation3 + $0x284] ss:$16 sps:$4 sm:$0xff]   ;;  %v1980_v23 = vld [vmem:[#allocation3 + $0x28c] ss:$16 sps:$4 sm:$0xff]  }
  0x2f   :  { %v1975_v24 = vld [vmem:[#allocation3 + $0x280] ss:$16 sps:$4 sm:$0xff]   ;;  %v1978_v25 = vld [vmem:[#allocation3 + $0x288] ss:$16 sps:$4 sm:$0xff]   ;;  %v1983_v26 = vld [vmem:[#allocation3 + $0x2a4] ss:$16 sps:$4 sm:$0xff]  }
  0x30   :  { %894 = vmatpush1.bf16.msra.mxu0 %v1901_v30  ;;  %1023 = vmatpush1.bf16.msra.mxu1 %v1902_v31  ;;  %v1986_v27 = vld [vmem:[#allocation3 + $0x2ac] ss:$16 sps:$4 sm:$0xff]   ;;  %v1981_v28 = vld [vmem:[#allocation3 + $0x2a0] ss:$16 sps:$4 sm:$0xff]   ;;  %v1984_v29 = vld [vmem:[#allocation3 + $0x2a8] ss:$16 sps:$4 sm:$0xff]  }
  0x31   :  { %895 = vmatprep.subr.bf16.mxu0 %v1903_v32  ;;  %1024 = vmatprep.subr.bf16.mxu1 %v1905_v33  ;;  %v1989_v30 = vld [vmem:[#allocation3 + $0x2c4] ss:$16 sps:$4 sm:$0xff]   ;;  %v1992_v31 = vld [vmem:[#allocation3 + $0x2cc] ss:$16 sps:$4 sm:$0xff]   ;;  %v2005_v47 = vld [vmem:[#allocation3 + $0x320] ss:$16 sps:$4 sm:$0xff]  }
  0x32   :  { %v48_v32 = vld [vmem:[%s2315_s0 + $0x18] sm:$0xff]  ;;  %v53_v33 = vld [vmem:[%s2315_s0 + $0x40] sm:$0xff]  ;;  %vm1515_vm4 = vcmask 130048   ;;  %vm1589_vm5 = vcmask 1024  }
  0x33   :  { %v2010_v46 = vld [vmem:[#allocation3 + $0x32c] ss:$16 sps:$4 sm:$0xff]   ;;  %v2038_v4 = vld [vmem:[#allocation3 + $0x3c8] ss:$16 sps:$4 sm:$0xff]   ;;  %v2043_v5 = vld [vmem:[#allocation3 + $0x3e4] ss:$16 sps:$4 sm:$0xff]  }
  0x34   :  { %896 = vmatpush1.bf16.msra.mxu0 %v1907_v34  ;;  %1025 = vmatpush1.bf16.msra.mxu1 %v1908_v35  ;;  %v1987_v34 = vld [vmem:[#allocation3 + $0x2c0] ss:$16 sps:$4 sm:$0xff]   ;;  %v1990_v35 = vld [vmem:[#allocation3 + $0x2c8] ss:$16 sps:$4 sm:$0xff]   ;;  %v2016_v50 = vld [vmem:[#allocation3 + $0x34c] ss:$16 sps:$4 sm:$0xff]  }
  0x35   :  { %897 = vmatprep.subr.bf16.mxu0 %v1909_v36  ;;  %1026 = vmatprep.subr.bf16.mxu1 %v1911_v37  ;;  %v1995_v36 = vld [vmem:[#allocation3 + $0x2e4] ss:$16 sps:$4 sm:$0xff]   ;;  %v58_v37 = vpack.c.bf16 %v53_v33, %v48_v32 }
  0x36   :  { %v2059_v32 = vld [vmem:[%s2318_s3 + $0x50] sm:$0xff]  }
  0x37   :  { %v2060_v33 = vld [vmem:[%s2318_s3 + $0xd0] sm:$0xff]  }
  0x38   :  { %898 = vmatpush1.bf16.msra.mxu0 %v1913_v38  ;;  %1027 = vmatpush1.bf16.msra.mxu1 %v1914_v39  ;;  %v1998_v38 = vld [vmem:[#allocation3 + $0x2ec] ss:$16 sps:$4 sm:$0xff]   ;;  %v1993_v39 = vld [vmem:[#allocation3 + $0x2e0] ss:$16 sps:$4 sm:$0xff]  }
  0x39   :  { %899 = vmatprep.subr.bf16.mxu0 %v1915_v40  ;;  %1028 = vmatprep.subr.bf16.mxu1 %v1917_v41  ;;  %v1996_v40 = vld [vmem:[#allocation3 + $0x2e8] ss:$16 sps:$4 sm:$0xff]   ;;  %v2001_v41 = vld [vmem:[#allocation3 + $0x304] ss:$16 sps:$4 sm:$0xff]  }
  0x3c   :  { %900 = vmatpush1.bf16.msra.mxu0 %v1919_v42  ;;  %1029 = vmatpush1.bf16.msra.mxu1 %v1920_v43  ;;  %v2004_v42 = vld [vmem:[#allocation3 + $0x30c] ss:$16 sps:$4 sm:$0xff]   ;;  %v1999_v43 = vld [vmem:[#allocation3 + $0x300] ss:$16 sps:$4 sm:$0xff]  }
  0x3d   :  { %901 = vmatprep.subr.bf16.mxu0 %v1921_v44  ;;  %1030 = vmatprep.subr.bf16.mxu1 %v1923_v45  ;;  %v2002_v44 = vld [vmem:[#allocation3 + $0x308] ss:$16 sps:$4 sm:$0xff]   ;;  %v2007_v45 = vld [vmem:[#allocation3 + $0x324] ss:$16 sps:$4 sm:$0xff]  }
  0x40   :  { %902 = vmatpush1.bf16.msra.mxu0 %v1925_v48  ;;  %1031 = vmatpush1.bf16.msra.mxu1 %v1926_v49  ;;  %v2008_v48 = vld [vmem:[#allocation3 + $0x328] ss:$16 sps:$4 sm:$0xff]   ;;  %v2013_v49 = vld [vmem:[#allocation3 + $0x344] ss:$16 sps:$4 sm:$0xff]  }
  0x41   :  { %903 = vmatprep.subr.bf16.mxu0 %v1927_v51  ;;  %1032 = vmatprep.subr.bf16.mxu1 %v1929_v52  ;;  %v2011_v51 = vld [vmem:[#allocation3 + $0x340] ss:$16 sps:$4 sm:$0xff]   ;;  %v2014_v52 = vld [vmem:[#allocation3 + $0x348] ss:$16 sps:$4 sm:$0xff]  }
  0x44   :  { %904 = vmatpush1.bf16.msra.mxu0 %v1931_v53  ;;  %1033 = vmatpush1.bf16.msra.mxu1 %v1932_v54  ;;  %v2019_v53 = vld [vmem:[#allocation3 + $0x364] ss:$16 sps:$4 sm:$0xff]   ;;  %v2022_v54 = vld [vmem:[#allocation3 + $0x36c] ss:$16 sps:$4 sm:$0xff]  }
  0x45   :  { %905 = vmatprep.subr.bf16.mxu0 %v1933_v55  ;;  %1034 = vmatprep.subr.bf16.mxu1 %v1935_v56  ;;  %v2017_v55 = vld [vmem:[#allocation3 + $0x360] ss:$16 sps:$4 sm:$0xff]   ;;  %v2020_v56 = vld [vmem:[#allocation3 + $0x368] ss:$16 sps:$4 sm:$0xff]  }
  0x48   :  { %906 = vmatpush1.bf16.msra.mxu0 %v1937_v57  ;;  %1035 = vmatpush1.bf16.msra.mxu1 %v1938_v58  ;;  %v2025_v57 = vld [vmem:[#allocation3 + $0x384] ss:$16 sps:$4 sm:$0xff]   ;;  %v2028_v58 = vld [vmem:[#allocation3 + $0x38c] ss:$16 sps:$4 sm:$0xff]  }
  0x49   :  { %907 = vmatprep.subr.bf16.mxu0 %v1939_v59  ;;  %1036 = vmatprep.subr.bf16.mxu1 %v1941_v60  ;;  %v2023_v59 = vld [vmem:[#allocation3 + $0x380] ss:$16 sps:$4 sm:$0xff]   ;;  %v2026_v60 = vld [vmem:[#allocation3 + $0x388] ss:$16 sps:$4 sm:$0xff]  }
  0x4c   :  { %908 = vmatpush1.bf16.msra.mxu0 %v1943_v61  ;;  %1037 = vmatpush1.bf16.msra.mxu1 %v1944_v62  ;;  %v2031_v61 = vld [vmem:[#allocation3 + $0x3a4] ss:$16 sps:$4 sm:$0xff]   ;;  %v2034_v62 = vld [vmem:[#allocation3 + $0x3ac] ss:$16 sps:$4 sm:$0xff]  }
  0x4d   :  { %909 = vmatprep.subr.bf16.mxu0 %v1945_v63  ;;  %1038 = vmatprep.subr.bf16.mxu1 %v1947_v0  ;;  %v2029_v63 = vld [vmem:[#allocation3 + $0x3a0] ss:$16 sps:$4 sm:$0xff]   ;;  %v2032_v0 = vld [vmem:[#allocation3 + $0x3a8] ss:$16 sps:$4 sm:$0xff]  }
  0x50   :  { %910 = vmatpush1.bf16.msra.mxu0 %v1949_v1  ;;  %1039 = vmatpush1.bf16.msra.mxu1 %v1950_v2  ;;  %v2037_v1 = vld [vmem:[#allocation3 + $0x3c4] ss:$16 sps:$4 sm:$0xff]   ;;  %v2040_v2 = vld [vmem:[#allocation3 + $0x3cc] ss:$16 sps:$4 sm:$0xff]  }
  0x51   :  { %922 = vmatprep.subr.bf16.mxu0 %v1953_v3  ;;  %1051 = vmatprep.subr.bf16.mxu1 %v1956_v6  ;;  %v2035_v3 = vld [vmem:[#allocation3 + $0x3c0] ss:$16 sps:$4 sm:$0xff]   ;;  %v2046_v6 = vld [vmem:[#allocation3 + $0x3ec] ss:$16 sps:$4 sm:$0xff]  }
  0x53   :  { %912 = vmatmul.mubr.bf16.vlgmr.msra.gmra.mrb[0].mxu0 %v55_v9  ;;  %1041 = vmatmul.mubr.bf16.vlgmr.msra.gmra.mrb[0].mxu1 %v55_v9  ;;  %v2041_v9 = vld [vmem:[#allocation3 + $0x3e0] ss:$16 sps:$4 sm:$0xff]  }
  0x54   :  { %923 = vmatpush1.bf16.msra.mxu0 %v1951_v7  ;;  %1052 = vmatpush1.bf16.msra.mxu1 %v1954_v8  ;;  %v188_v7 = vld [vmem:[#allocation3 + $0x400] sm:$0x33]  ;;  %v189_v8 = vld [vmem:[#allocation3 + $0x408] sm:$0x33] }
  0x55   :  { %924 = vmatprep.subr.bf16.mxu0 %v1959_v10  ;;  %1053 = vmatprep.subr.bf16.mxu1 %v1962_v11  ;;  %v2044_v10 = vld [vmem:[#allocation3 + $0x3e8] ss:$16 sps:$4 sm:$0xff]   ;;  %v47_v11 = vld [vmem:[%s2315_s0 + $0x10] sm:$0xff] }
  0x56   :  { %954 = vmatprep.mubr.bf16.mxu0 %v58_v37  ;;  %1083 = vmatprep.mubr.bf16.mxu1 %v58_v37  ;;  %v2064_v37 = vld [vmem:[%s2318_s3 + $0xd8] sm:$0xff]  }
  0x58   :  { %925 = vmatpush1.bf16.msra.mxu0 %v1957_v12  ;;  %1054 = vmatpush1.bf16.msra.mxu1 %v1960_v13  ;;  %v52_v12 = vld [vmem:[%s2315_s0 + $0x38] sm:$0xff]  ;;  %v1725_v13 = vcombine.high %v188_v7, %v188_v7 }
  0x59   :  { %926 = vmatprep.subr.bf16.mxu0 %v1965_v14  ;;  %1055 = vmatprep.subr.bf16.mxu1 %v1968_v15  ;;  %v1724_v14 = vcombine.low %v188_v7, %v188_v7  ;;  %v1727_v15 = vcombine.high %v189_v8, %v189_v8 }
  0x5c   :  { %927 = vmatpush1.bf16.msra.mxu0 %v1963_v16  ;;  %1056 = vmatpush1.bf16.msra.mxu1 %v1966_v17  ;;  %v1726_v16 = vcombine.low %v189_v8, %v189_v8  ;;  %v57_v17 = vpack.c.bf16 %v52_v12, %v47_v11 }
  0x5d   :  { %928 = vmatprep.subr.bf16.mxu0 %v1971_v18  ;;  %1057 = vmatprep.subr.bf16.mxu1 %v1974_v19  ;;  %v868_v18 = vsel %vm866_vm0, %v1724_v14, 0 }
  0x5e   :  { %v874_v19 = vsel %vm866_vm0, %v1726_v16, 0 }
  0x60   :  { %929 = vmatpush1.bf16.msra.mxu0 %v1969_v20  ;;  %1058 = vmatpush1.bf16.msra.mxu1 %v1972_v21  ;;  %v2051_v20 = vld [vmem:[%s2318_s3 + $0x40] sm:$0xff]  }
  0x61   :  { %930 = vmatprep.subr.bf16.mxu0 %v1977_v22  ;;  %1059 = vmatprep.subr.bf16.mxu1 %v1980_v23  ;;  %v2052_v21 = vld [vmem:[%s2318_s3 + $0xc0] sm:$0xff]   ;;  %v2110_v22 = vmov 0  }
  0x62   :  { %v49_v23 = vld [vmem:[%s2315_s0 + $0x20] sm:$0xff] }
  0x64   :  { %931 = vmatpush1.bf16.msra.mxu0 %v1975_v24  ;;  %1060 = vmatpush1.bf16.msra.mxu1 %v1978_v25  ;;  %v54_v24 = vld [vmem:[%s2315_s0 + $0x48] sm:$0xff] }
  0x65   :  { %932 = vmatprep.subr.bf16.mxu0 %v1983_v26  ;;  %1061 = vmatprep.subr.bf16.mxu1 %v1986_v27  ;;  %v59_v25 = vpack.c.bf16 %v54_v24, %v49_v23  ;;  %v2053_v26 = vld [vmem:[%s2318_s3] sm:$0xff]  }
  0x66   :  { %v2054_v27 = vld [vmem:[%s2318_s3 + $0x80] sm:$0xff]  }
  0x68   :  { %933 = vmatpush1.bf16.msra.mxu0 %v1981_v28  ;;  %1062 = vmatpush1.bf16.msra.mxu1 %v1984_v29  ;;  %v2055_v28 = vld [vmem:[%s2318_s3 + $0x48] sm:$0xff]  }
  0x69   :  { %934 = vmatprep.subr.bf16.mxu0 %v1989_v30  ;;  %1063 = vmatprep.subr.bf16.mxu1 %v1992_v31  ;;  %v2056_v29 = vld [vmem:[%s2318_s3 + $0xc8] sm:$0xff]  }
  0x6a   :  { %v2057_v30 = vld [vmem:[%s2318_s3 + $0x8] sm:$0xff]  }
  0x6b   :  { %v2058_v31 = vld [vmem:[%s2318_s3 + $0x88] sm:$0xff]  }
  0x6c   :  { %935 = vmatpush1.bf16.msra.mxu0 %v1987_v34  ;;  %1064 = vmatpush1.bf16.msra.mxu1 %v1990_v35  ;;  %v2061_v34 = vld [vmem:[%s2318_s3 + $0x10] sm:$0xff]  }
  0x6d   :  { %936 = vmatprep.subr.bf16.mxu0 %v1995_v36  ;;  %1065 = vmatprep.subr.bf16.mxu1 %v1998_v38  ;;  %v2062_v35 = vld [vmem:[%s2318_s3 + $0x90] sm:$0xff]   ;;  %v2063_v36 = vld [vmem:[%s2318_s3 + $0x58] sm:$0xff]  }
  0x6e   :  { %v2065_v38 = vld [vmem:[%s2318_s3 + $0x18] sm:$0xff]  }
  0x70   :  { %937 = vmatpush1.bf16.msra.mxu0 %v1993_v39  ;;  %1066 = vmatpush1.bf16.msra.mxu1 %v1996_v40  ;;  %v2066_v39 = vld [vmem:[%s2318_s3 + $0x98] sm:$0xff]   ;;  %v2067_v40 = vld [vmem:[%s2318_s3 + $0x60] sm:$0xff]  }
  0x71   :  { %938 = vmatprep.subr.bf16.mxu0 %v2001_v41  ;;  %1067 = vmatprep.subr.bf16.mxu1 %v2004_v42  ;;  %v2068_v41 = vld [vmem:[%s2318_s3 + $0xe0] sm:$0xff]  }
  0x72   :  { %v2069_v42 = vld [vmem:[%s2318_s3 + $0x20] sm:$0xff]  }
  0x74   :  { %939 = vmatpush1.bf16.msra.mxu0 %v1999_v43  ;;  %1068 = vmatpush1.bf16.msra.mxu1 %v2002_v44  ;;  %v2070_v43 = vld [vmem:[%s2318_s3 + $0xa0] sm:$0xff]   ;;  %v2071_v44 = vld [vmem:[%s2318_s3 + $0x68] sm:$0xff]  }
  0x75   :  { %940 = vmatprep.subr.bf16.mxu0 %v2007_v45  ;;  %1069 = vmatprep.subr.bf16.mxu1 %v2010_v46  ;;  %v2072_v45 = vld [vmem:[%s2318_s3 + $0xe8] sm:$0xff]  }
  0x76   :  { %v2073_v46 = vld [vmem:[%s2318_s3 + $0x28] sm:$0xff]  }
  0x78   :  { %941 = vmatpush1.bf16.msra.mxu0 %v2005_v47  ;;  %1070 = vmatpush1.bf16.msra.mxu1 %v2008_v48  ;;  %v2074_v47 = vld [vmem:[%s2318_s3 + $0xa8] sm:$0xff]   ;;  %v2075_v48 = vld [vmem:[%s2318_s3 + $0x70] sm:$0xff]  }
  0x79   :  { %942 = vmatprep.subr.bf16.mxu0 %v2013_v49  ;;  %1071 = vmatprep.subr.bf16.mxu1 %v2016_v50  ;;  %v2076_v49 = vld [vmem:[%s2318_s3 + $0xf0] sm:$0xff]  }
  0x7a   :  { %v2077_v50 = vld [vmem:[%s2318_s3 + $0x30] sm:$0xff]  }
  0x7c   :  { %943 = vmatpush1.bf16.msra.mxu0 %v2011_v51  ;;  %1072 = vmatpush1.bf16.msra.mxu1 %v2014_v52  ;;  %v2078_v51 = vld [vmem:[%s2318_s3 + $0xb0] sm:$0xff]   ;;  %v2079_v52 = vld [vmem:[%s2318_s3 + $0x78] sm:$0xff]  }
  0x7d   :  { %944 = vmatprep.subr.bf16.mxu0 %v2019_v53  ;;  %1073 = vmatprep.subr.bf16.mxu1 %v2022_v54  ;;  %v2080_v53 = vld [vmem:[%s2318_s3 + $0xf8] sm:$0xff]  }
  0x7e   :  { %v2081_v54 = vld [vmem:[%s2318_s3 + $0x38] sm:$0xff]  }
  0x80   :  { %945 = vmatpush1.bf16.msra.mxu0 %v2017_v55  ;;  %1074 = vmatpush1.bf16.msra.mxu1 %v2020_v56  ;;  %v2082_v55 = vld [vmem:[%s2318_s3 + $0xb8] sm:$0xff]   ;;  %v192_v56 = vlaneseq }
  0x81   :  { %946 = vmatprep.subr.bf16.mxu0 %v2025_v57  ;;  %1075 = vmatprep.subr.bf16.mxu1 %v2028_v58 }
  0x82   :  { %v193_v57 = vshrl.u32 %v192_v56, 7  ;;  %v2113_v56 = vmov 0.0  }
  0x84   :  { %947 = vmatpush1.bf16.msra.mxu0 %v2023_v59  ;;  %1076 = vmatpush1.bf16.msra.mxu1 %v2026_v60  ;;  %v194_v58 = vsub.s32 0, %v193_v57  ;;  %v202_v59 = vsub.s32 2, %v193_v57  ;;  %v190_v60 = vld [vmem:[%s2317_s2] sm:$0xf] }
  0x85   :  { %948 = vmatprep.subr.bf16.mxu0 %v2031_v61  ;;  %1077 = vmatprep.subr.bf16.mxu1 %v2034_v62  ;;  %v198_v61 = vsub.s32 1, %v193_v57  ;;  %v206_v62 = vsub.s32 3, %v193_v57 }
  0x88   :  { %949 = vmatpush1.bf16.msra.mxu0 %v2029_v63  ;;  %1078 = vmatpush1.bf16.msra.mxu1 %v2032_v0  ;;  %v195_v63 = vrot.slane %v190_v60, %v194_v58  ;;  %v203_v0 = vrot.slane %v190_v60, %v202_v59 }
  0x89   :  { %950 = vmatprep.subr.bf16.mxu0 %v2037_v1  ;;  %1079 = vmatprep.subr.bf16.mxu1 %v2040_v2  ;;  %v199_v1 = vrot.slane %v190_v60, %v198_v61  ;;  %v207_v2 = vrot.slane %v190_v60, %v206_v62  ;;  %v1512_v60 = vld [vmem:[%s2321_s6] sm:$0x3]  ;;  %v1514_v61 = vstv %s2322_s7 }
  0x8c   :  { %951 = vmatpush1.bf16.msra.mxu0 %v2035_v3  ;;  %1080 = vmatpush1.bf16.msra.mxu1 %v2038_v4 }
  0x8d   :  { %952 = vmatprep.subr.bf16.mxu0 %v2043_v5  ;;  %1081 = vmatprep.subr.bf16.mxu1 %v2046_v6 }
  0x90   :  { %953 = vmatpush1.bf16.msra.mxu0 %v2041_v9  ;;  %1082 = vmatpush1.bf16.msra.mxu1 %v2044_v10 }
  0x91   :  { %1728 = vmatprep.subr.msk.bf16.mxu0 %vm866_vm0, %v1725_v13  ;;  %1730 = vmatprep.subr.msk.bf16.mxu1 %vm866_vm0, %v1727_v15 }
  0x93   :  { %955 = vmatmul.mubr.bf16.vlgmr.msra.gmra.mrb[0].mxu0 %v57_v17  ;;  %1084 = vmatmul.mubr.bf16.vlgmr.msra.gmra.mrb[0].mxu1 %v57_v17 }
  0x94   :  { %966 = vmatpush1.bf16.msra.mxu0 %v868_v18  ;;  %1095 = vmatpush1.bf16.msra.mxu1 %v874_v19 }
  0x95   :  { %997 = vmatprep.mubr.bf16.mxu0 %v2110_v22  ;;  %1126 = vmatprep.mubr.bf16.mxu1 %v2110_v22 }
  0x96   :  { %1767 = vmatprep.subr.bf16.mxu0 %v2051_v20  ;;  %1789 = vmatprep.subr.bf16.mxu1 %v2052_v21 }
  0x9f   :  { %1729 = vmatmul.mubr.msk.bf16.vlgmr.msra.gmra.mrb[0].mxu0 %vm862_vm1, %v59_v25  ;;  %1731 = vmatmul.mubr.msk.bf16.vlgmr.msra.gmra.mrb[0].mxu1 %vm862_vm1, %v59_v25 }
  0xa0   :  { %1768 = vmatpush3.bf16.msra.mxu0 %v2053_v26  ;;  %1790 = vmatpush3.bf16.msra.mxu1 %v2054_v27 }
  0xa1   :  { %1769 = vmatprep.subr.bf16.mxu0 %v2055_v28  ;;  %1791 = vmatprep.subr.bf16.mxu1 %v2056_v29 }
  0xa4   :  { %1770 = vmatpush3.bf16.msra.mxu0 %v2057_v30  ;;  %1792 = vmatpush3.bf16.msra.mxu1 %v2058_v31 }
  0xa5   :  { %1771 = vmatprep.subr.bf16.mxu0 %v2059_v32  ;;  %1793 = vmatprep.subr.bf16.mxu1 %v2060_v33  ;;  %v1732_v33 = vld [vmem:[%s2319_s4] ss:$0 sm:$0xff] }
  0xa8   :  { %1772 = vmatpush3.bf16.msra.mxu0 %v2061_v34  ;;  %1794 = vmatpush3.bf16.msra.mxu1 %v2062_v35 }
  0xa9   :  { %1773 = vmatprep.subr.bf16.mxu0 %v2063_v36  ;;  %1795 = vmatprep.subr.bf16.mxu1 %v2064_v37 }
  0xac   :  { %1774 = vmatpush3.bf16.msra.mxu0 %v2065_v38  ;;  %1796 = vmatpush3.bf16.msra.mxu1 %v2066_v39 }
  0xad   :  { %1775 = vmatprep.subr.bf16.mxu0 %v2067_v40  ;;  %1797 = vmatprep.subr.bf16.mxu1 %v2068_v41 }
  0xb0   :  { %1776 = vmatpush3.bf16.msra.mxu0 %v2069_v42  ;;  %1798 = vmatpush3.bf16.msra.mxu1 %v2070_v43 }
  0xb1   :  { %1777 = vmatprep.subr.bf16.mxu0 %v2071_v44  ;;  %1799 = vmatprep.subr.bf16.mxu1 %v2072_v45 }
  0xb4   :  { %1778 = vmatpush3.bf16.msra.mxu0 %v2073_v46  ;;  %1800 = vmatpush3.bf16.msra.mxu1 %v2074_v47  ;;  %v1765_v47 = vld [vmem:[%s2320_s5] ss:$0 sm:$0xff] }
  0xb5   :  { %1779 = vmatprep.subr.bf16.mxu0 %v2075_v48  ;;  %1801 = vmatprep.subr.bf16.mxu1 %v2076_v49 }
  0xb8   :  { %1780 = vmatpush3.bf16.msra.mxu0 %v2077_v50  ;;  %1802 = vmatpush3.bf16.msra.mxu1 %v2078_v51 }
  0xb9   :  { %1781 = vmatprep.subr.bf16.mxu0 %v2079_v52  ;;  %1803 = vmatprep.subr.bf16.mxu1 %v2080_v53 }
  0xbc   :  { %1782 = vmatpush3.bf16.msra.mxu0 %v2081_v54  ;;  %1804 = vmatpush3.bf16.msra.mxu1 %v2082_v55  ;;  %v2111_v55 = vmov 0.0|0.0  }
  0xbd   :  { %1821 = vmatprep.subr.bf16.mxu0 %v2111_v55 }
 0x172   :  { %v999_v3 = vpop.f32.mrb[0].mxu0  ;;  %v1128_v4 = vpop.f32.mrb[0].mxu1 }
 0x173   :  { %v1824_v5 = vadd.f32 %v999_v3, %v195_v63  ;;  %v1828_v6 = vadd.f32 %v1128_v4, %v203_v0  ;;  %v1001_v7 = vpop.f32.mrb[1].mxu0  ;;  %v1130_v8 = vpop.f32.mrb[1].mxu1 }
 0x174   :  { %v1825_v9 = vadd.f32 %v1001_v7, %v199_v1  ;;  %v1829_v10 = vadd.f32 %v1130_v8, %v207_v2  ;;  %v1003_v11 = vpop.f32.mrb[2].mxu0  ;;  %v1132_v12 = vpop.f32.mrb[2].mxu1 }
 0x175   :  { %v1826_v13 = vadd.f32 %v1003_v11, %v195_v63  ;;  %v1830_v14 = vadd.f32 %v1132_v12, %v203_v0  ;;  %v1005_v15 = vpop.f32.mrb[3].mxu0  ;;  %v1134_v16 = vpop.f32.mrb[3].mxu1  ;;  %v1137_v19 = vmax.f32 %v1824_v5, 0.0  ;;  %v1139_v20 = vmax.f32 %v1828_v6, 0.0 }
 0x176   :  { %v1827_v17 = vadd.f32 %v1005_v15, %v199_v1  ;;  %v1831_v18 = vadd.f32 %v1134_v16, %v207_v2  ;;  %v1138_v23 = vmax.f32 %v1825_v9, 0.0  ;;  %v1140_v24 = vmax.f32 %v1829_v10, 0.0 }
 0x177   :  { %v1141_v21 = vmax.f32 %v1826_v13, 0.0  ;;  %v1143_v22 = vmax.f32 %v1830_v14, 0.0 }
 0x178   :  { %v1142_v25 = vmax.f32 %v1827_v17, 0.0  ;;  %v1144_v26 = vmax.f32 %v1831_v18, 0.0 }
 0x179   :  { %v1145_v27 = vpack.c.bf16 %v1141_v21, %v1137_v19  ;;  %v1147_v28 = vpack.c.bf16 %v1143_v22, %v1139_v20 }
 0x17a   :  { %v1146_v29 = vpack.c.bf16 %v1142_v25, %v1138_v23  ;;  %v1148_v30 = vpack.c.bf16 %v1144_v26, %v1140_v24 }
 0x17c   :  { %1444 = vmatprep.mubr.bf16.mxu0 %v1146_v29  ;;  %1485 = vmatprep.mubr.bf16.mxu1 %v1148_v30 }
 0x17d   :  { %1445 = vmatmul.mubr.bf16.vlgmr.msra.gmra.mrb[4].mxu0 %v1145_v27  ;;  %1486 = vmatmul.mubr.bf16.vlgmr.msra.gmra.mrb[4].mxu1 %v1147_v28 }
 0x17e   :  { %1818 = vmatprep.mubr.msk.f32.mxu0 %vm2112_vm3, %v2113_v56 }
 0x250   :  { %v1783_v31 = vpop.f32.mrb[4].mxu0  ;;  %v1805_v32 = vpop.f32.mrb[4].mxu1 }
 0x251   :  { %v1784_v34 = vpop.f32.mrb[5].mxu0  ;;  %v1806_v35 = vpop.f32.mrb[5].mxu1 }
 0x252   :  { %v1785_v36 = vadd.f32 %v1784_v34, %v1783_v31  ;;  %v1807_v37 = vadd.f32 %v1806_v35, %v1805_v32  ;;  %v1786_v38 = vpop.f32.mrb[6].mxu0  ;;  %v1808_v39 = vpop.f32.mrb[6].mxu1 }
 0x253   :  { %v1787_v40 = vpop.f32.mrb[7].mxu0  ;;  %v1809_v41 = vpop.f32.mrb[7].mxu1 }
 0x254   :  { %v1447_v42 = vadd.f32 %v1785_v36, %v1732_v33  ;;  %v1788_v43 = vadd.f32 %v1787_v40, %v1786_v38  ;;  %v1810_v44 = vadd.f32 %v1809_v41, %v1808_v39 }
 0x256   :  { %v1488_v45 = vadd.f32 %v1807_v37, %v1447_v42  ;;  %v1450_v46 = vadd.f32 %v1788_v43, %v1732_v33 }
 0x258   :  { %v1494_v48 = vmax.f32 %v1488_v45, 0.0  ;;  %v1491_v49 = vadd.f32 %v1810_v44, %v1450_v46 }
 0x25a   :  { %v1495_v50 = vmax.f32 %v1491_v49, 0.0  ;;  %v1503_v51 = vmul.f32 %v1765_v47, %v1494_v48 }
 0x25c   :  { %v1506_v52 = vsel %vm1505_vm2, %v1503_v51, 0.0  ;;  %v1504_v53 = vmul.f32 %v1765_v47, %v1495_v50 }
 0x25d   :  { %1507 = vadd.xlane.f32.xlu0 %v1506_v52 }
 0x25e   :  { %v1509_v54 = vsel %vm1505_vm2, %v1504_v53, 0.0 }
 0x261   :  { %1510 = vadd.xlane.f32.xlu0 %v1509_v54 }
 0x2ea   :  { %v1508_v57 = vpop.xlane.xlu0 %1507 }
 0x2ee   :  { %v1511_v58 = vpop.xlane.xlu0 %1510 }
 0x2ef   :  { %v1822_v59 = vpack.c.bf16 %v1511_v58, %v1508_v57 }
 0x2f1   :  { %1823 = vmatpush3.bf16.msra.mxu0 %v1822_v59 }
 0x2f4   :  { %1819 = vmatmul.mubr.msk.f32.vlgmr.msra.gmra.mrb[8].mxu0 %vm1515_vm4, %v1512_v60 }
 0x3c7   :  { %v1585_v62 = vpop.f32.mrb[8].mxu0 }
 0x3c8   :  { %v1586_v63 = vadd.f32 %v1585_v62, %v1514_v61  ;;  %v1820_v0 = vpop.f32.mrb[9].mxu0 }
 0x3ca   :  { %1590 = vst.msk [vmem:[%s2323_s8] sm:$0x3] %vm1589_vm5, %v1586_v63 }
 0x3cb   :  { %1595 = vsyncpa [#allocation4], 1 }

</bundles_post_ra>
